<compile_context>
chip_gen: v5e
topology: v5e:2x2
jax: 0.10.0
libtpu: 0.0.40
codegen_flags: <defaults>
</compile_context>

<pallas_src>
import jax
import jax.numpy as jnp
from jax import lax
from jax.experimental import pallas as pl
from jax.experimental.pallas import tpu as pltpu


def _round_up(x, m):
    return ((x + m - 1) // m) * m


def _pick_tiles(M, D, V, itemsize, vmem_budget_bytes):
    """Row / vocab tile sizes that keep double-buffered blocks in VMEM."""
    tm = min(256, _round_up(M, 8))            # rows per step (MXU height)
    v_pad = _round_up(V, 128)
    # 2 * (x_blk + w_blk + logits_blk) * itemsize <= budget  ->  solve for tn.
    avail = vmem_budget_bytes // (2 * itemsize) - tm * D
    tn_max = max(avail // (D + tm), 128)
    tn = min(v_pad, 2048, (tn_max // 128) * 128)
    tn = max(tn, 128)
    return tm, tn


def projection_layer(x, weight, bias, *, tm=None, tn=None,
                     vmem_budget_bytes=24 * 1024 * 1024):
    """log_softmax(x @ weight.T + bias, axis=-1).

    x:      [..., d_model]
    weight: [vocab_size, d_model]  (nn.Linear layout, used untransposed)
    bias:   [vocab_size]
    """
    *lead, D = x.shape
    V, D_w = weight.shape
    assert D == D_w, "weight must be [vocab_size, d_model]"
    M = 1
    for s in lead:
        M *= s

    out_dtype = x.dtype
    x2d = x.reshape(M, D)
    b2d = bias.reshape(1, V)

    auto_tm, auto_tn = _pick_tiles(M, D, V, 4, vmem_budget_bytes)
    tm = auto_tm if tm is None else tm
    tn = auto_tn if tn is None else tn

    grid_m = pl.cdiv(M, tm)
    grid_v = pl.cdiv(V, tn)
    mask_vocab_tail = (V % tn) != 0

    # ---- Pass 1: logits tiles + streaming log-sum-exp ----------------------
    def lse_kernel(x_ref, w_ref, b_ref, logits_ref, lse_ref, m_sc, l_sc):
        vj = pl.program_id(1)

        @pl.when(vj == 0)
        def _():
            m_sc[...] = jnp.full_like(m_sc, -jnp.inf)
            l_sc[...] = jnp.zeros_like(l_sc)

        # (tm, D) . (tn, D)^T -> (tm, tn); MXU handles the transposed contraction.
        logits = lax.dot_general(
            x_ref[...], w_ref[...],
            dimension_numbers=(((1,), (1,)), ((), ())),
            preferred_element_type=jnp.float32,
        ) + b_ref[...].astype(jnp.float32)

        if mask_vocab_tail:
            col = vj * tn + lax.broadcasted_iota(jnp.int32, (tm, tn), 1)
            logits = jnp.where(col < V, logits, -jnp.inf)

        tile_max = jnp.max(logits, axis=-1, keepdims=True)
        m_new = jnp.maximum(m_sc[...], tile_max)
        l_sc[...] = (l_sc[...] * jnp.exp(m_sc[...] - m_new)
                     + jnp.sum(jnp.exp(logits - m_new), axis=-1, keepdims=True))
        m_sc[...] = m_new

        logits_ref[...] = logits.astype(logits_ref.dtype)

        @pl.when(vj == pl.num_programs(1) - 1)
        def _():
            lse_ref[...] = m_sc[...] + jnp.log(l_sc[...])

    logits, lse = pl.pallas_call(
        lse_kernel,
        out_shape=(jax.ShapeDtypeStruct((M, V), out_dtype),
                   jax.ShapeDtypeStruct((M, 1), jnp.float32)),
        grid_spec=pltpu.PrefetchScalarGridSpec(
            num_scalar_prefetch=0,
            grid=(grid_m, grid_v),
            in_specs=[
                pl.BlockSpec((tm, D), lambda i, j: (i, 0)),   # activations (resident over V sweep)
                pl.BlockSpec((tn, D), lambda i, j: (j, 0)),   # weight [V, D], streamed over V
                pl.BlockSpec((1, tn), lambda i, j: (0, j)),   # bias
            ],
            out_specs=[
                pl.BlockSpec((tm, tn), lambda i, j: (i, j)),  # raw logits (lane-dense)
                pl.BlockSpec((tm, 1), lambda i, j: (i, 0)),   # log-sum-exp accumulator
            ],
            scratch_shapes=[pltpu.VMEM((tm, 1), jnp.float32),   # running max
                            pltpu.VMEM((tm, 1), jnp.float32)],  # running sum-exp
        ),
        compiler_params=pltpu.CompilerParams(
            dimension_semantics=("parallel", "arbitrary"),
            vmem_limit_bytes=32 * 1024 * 1024,
        ),
    )(x2d, weight, b2d)

    # ---- Pass 2: out = logits - lse, in place over the logits buffer -------
    def normalize_kernel(logits_ref, lse_ref, o_ref):
        o_ref[...] = (logits_ref[...].astype(jnp.float32)
                      - lse_ref[...]).astype(o_ref.dtype)

    out2d = pl.pallas_call(
        normalize_kernel,
        out_shape=jax.ShapeDtypeStruct((M, V), out_dtype),
        grid=(grid_m, grid_v),
        in_specs=[
            pl.BlockSpec((tm, tn), lambda i, j: (i, j)),
            pl.BlockSpec((tm, 1), lambda i, j: (i, 0)),
        ],
        out_specs=pl.BlockSpec((tm, tn), lambda i, j: (i, j)),
        input_output_aliases={0: 0},   # reuse the logits HBM buffer
        compiler_params=pltpu.CompilerParams(
            dimension_semantics=("parallel", "parallel")),
    )(logits, lse)

    return out2d.reshape(*lead, V)


if __name__ == "__main__":
    # Small, module-consistent shapes: batch=2, seq=8, d_model=32, vocab=128.
    B, S, D, V = 2, 8, 32, 128

    key = jax.random.PRNGKey(0)
    kx, kw, kb = jax.random.split(key, 3)

    # Deterministic nn.Linear-style uniform init.
    bound = 1.0 / (D ** 0.5)
    weight = jax.random.uniform(kw, (V, D), jnp.float32, -bound, bound)
    bias = jax.random.uniform(kb, (V,), jnp.float32, -bound, bound)
    x = jax.random.normal(kx, (B, S, D), jnp.float32)

    out = projection_layer(x, weight, bias)
    out = jax.block_until_ready(out)

    # Reference check (plain JAX) to validate semantics.
    ref = jax.nn.log_softmax(x @ weight.T + bias, axis=-1)
    assert out.shape == (B, S, V)
    assert jnp.allclose(out, ref, atol=1e-4, rtol=1e-4)

    print("KERNEL_OK")
</pallas_src>

<mosaic_0001>
module attributes {stable_mosaic.version = 11 : i64} {
  func.func @lse_kernel(%arg0: i32, %arg1: i32, %arg2: memref<16x32xf32, #tpu.memory_space<vmem>>, %arg3: memref<128x32xf32, #tpu.memory_space<vmem>>, %arg4: memref<1x128xf32, #tpu.memory_space<vmem>>, %arg5: memref<16x128xf32, #tpu.memory_space<vmem>>, %arg6: memref<16x1xf32, #tpu.memory_space<vmem>>, %arg7: memref<16x1xf32, #tpu.memory_space<vmem>>, %arg8: memref<16x1xf32, #tpu.memory_space<vmem>>) attributes {dimension_semantics = [#tpu.dimension_semantics<parallel>, #tpu.dimension_semantics<arbitrary>], iteration_bounds = array<i64: 1, 1>, scalar_prefetch = 0 : i64, scratch_operands = 2 : i64, tpu.core_type = #tpu.core_type<tc>, window_params = [{transform_indices = @transform_0, window_bounds = array<i64: 16, 32>}, {transform_indices = @transform_1, window_bounds = array<i64: 128, 32>}, {transform_indices = @transform_2, window_bounds = array<i64: 1, 128>}, {transform_indices = @transform_3, window_bounds = array<i64: 16, 128>}, {transform_indices = @transform_4, window_bounds = array<i64: 16, 1>}]} {
    %c0_i32 = arith.constant 0 : i32
    %0 = arith.cmpi eq, %arg1, %c0_i32 : i32
    %1 = arith.extui %0 : i1 to i32
    %c0_i32_0 = arith.constant 0 : i32
    %2 = arith.cmpi ne, %1, %c0_i32_0 : i32
    scf.if %2 {
      %cst_22 = arith.constant 0xFF800000 : f32
      %30 = vector.broadcast %cst_22 : f32 to vector<16x1xf32>
      %c0_23 = arith.constant 0 : index
      %c0_24 = arith.constant 0 : index
      %31 = vector.load %arg7[%c0_23, %c0_24] : memref<16x1xf32, #tpu.memory_space<vmem>>, vector<16x1xf32>
      tpu.vector_store %arg7[%c0_23, %c0_24], %30 {strides = array<i32>} : memref<16x1xf32, #tpu.memory_space<vmem>>, vector<16x1xf32>,
      %cst_25 = arith.constant 0.000000e+00 : f32
      %32 = vector.broadcast %cst_25 : f32 to vector<16x1xf32>
      %c0_26 = arith.constant 0 : index
      %c0_27 = arith.constant 0 : index
      %33 = vector.load %arg8[%c0_26, %c0_27] : memref<16x1xf32, #tpu.memory_space<vmem>>, vector<16x1xf32>
      tpu.vector_store %arg8[%c0_26, %c0_27], %32 {strides = array<i32>} : memref<16x1xf32, #tpu.memory_space<vmem>>, vector<16x1xf32>,
    } else {
    }
    %c0 = arith.constant 0 : index
    %c0_1 = arith.constant 0 : index
    %3 = vector.load %arg2[%c0, %c0_1] : memref<16x32xf32, #tpu.memory_space<vmem>>, vector<16x32xf32>
    %c0_2 = arith.constant 0 : index
    %c0_3 = arith.constant 0 : index
    %4 = vector.load %arg3[%c0_2, %c0_3] : memref<128x32xf32, #tpu.memory_space<vmem>>, vector<128x32xf32>
    %cst = arith.constant dense<0.000000e+00> : vector<16x128xf32>
    %5 = tpu.matmul %3, %4, %cst {dimension_numbers = #tpu.dot_dimension_numbers<[1], [1], [0], [0], [0, 0, 1, 0], [], []>} : vector<16x32xf32>, vector<128x32xf32>, vector<16x128xf32> -> vector<16x128xf32>
    %c0_4 = arith.constant 0 : index
    %c0_5 = arith.constant 0 : index
    %6 = vector.load %arg4[%c0_4, %c0_5] : memref<1x128xf32, #tpu.memory_space<vmem>>, vector<1x128xf32>
    %7 = vector.broadcast %6 : vector<1x128xf32> to vector<16x128xf32>
    %8 = arith.addf %5, %7 : vector<16x128xf32>
    %cst_6 = arith.constant dense<0xFF800000> : vector<16xf32>
    %9 = vector.multi_reduction <maximumf>, %8, %cst_6 [1] : vector<16x128xf32> to vector<16xf32>
    %10 = vector.shape_cast %9 : vector<16xf32> to vector<16x1xf32>
    %c0_7 = arith.constant 0 : index
    %c0_8 = arith.constant 0 : index
    %11 = vector.load %arg7[%c0_7, %c0_8] : memref<16x1xf32, #tpu.memory_space<vmem>>, vector<16x1xf32>
    %12 = arith.maximumf %11, %10 : vector<16x1xf32>
    %c0_9 = arith.constant 0 : index
    %c0_10 = arith.constant 0 : index
    %13 = vector.load %arg8[%c0_9, %c0_10] : memref<16x1xf32, #tpu.memory_space<vmem>>, vector<16x1xf32>
    %c0_11 = arith.constant 0 : index
    %c0_12 = arith.constant 0 : index
    %14 = vector.load %arg7[%c0_11, %c0_12] : memref<16x1xf32, #tpu.memory_space<vmem>>, vector<16x1xf32>
    %15 = arith.subf %14, %12 : vector<16x1xf32>
    %16 = math.exp %15 : vector<16x1xf32>
    %17 = arith.mulf %13, %16 : vector<16x1xf32>
    %18 = vector.broadcast %12 : vector<16x1xf32> to vector<16x128xf32>
    %19 = arith.subf %8, %18 : vector<16x128xf32>
    %20 = math.exp %19 : vector<16x128xf32>
    %cst_13 = arith.constant dense<0.000000e+00> : vector<16xf32>
    %21 = vector.multi_reduction <add>, %20, %cst_13 [1] : vector<16x128xf32> to vector<16xf32>
    %22 = vector.shape_cast %21 : vector<16xf32> to vector<16x1xf32>
    %23 = arith.addf %17, %22 : vector<16x1xf32>
    %c0_14 = arith.constant 0 : index
    %c0_15 = arith.constant 0 : index
    %24 = vector.load %arg8[%c0_14, %c0_15] : memref<16x1xf32, #tpu.memory_space<vmem>>, vector<16x1xf32>
    tpu.vector_store %arg8[%c0_14, %c0_15], %23 {strides = array<i32>} : memref<16x1xf32, #tpu.memory_space<vmem>>, vector<16x1xf32>,
    %c0_16 = arith.constant 0 : index
    %c0_17 = arith.constant 0 : index
    %25 = vector.load %arg7[%c0_16, %c0_17] : memref<16x1xf32, #tpu.memory_space<vmem>>, vector<16x1xf32>
    tpu.vector_store %arg7[%c0_16, %c0_17], %12 {strides = array<i32>} : memref<16x1xf32, #tpu.memory_space<vmem>>, vector<16x1xf32>,
    %c0_18 = arith.constant 0 : index
    %c0_19 = arith.constant 0 : index
    %26 = vector.load %arg5[%c0_18, %c0_19] : memref<16x128xf32, #tpu.memory_space<vmem>>, vector<16x128xf32>
    tpu.vector_store %arg5[%c0_18, %c0_19], %8 {strides = array<i32>} : memref<16x128xf32, #tpu.memory_space<vmem>>, vector<16x128xf32>,
    %c0_i32_20 = arith.constant 0 : i32
    %27 = arith.cmpi eq, %arg1, %c0_i32_20 : i32
    %28 = arith.extui %27 : i1 to i32
    %c0_i32_21 = arith.constant 0 : i32
    %29 = arith.cmpi ne, %28, %c0_i32_21 : i32
    scf.if %29 {
      %c0_22 = arith.constant 0 : index
      %c0_23 = arith.constant 0 : index
      %30 = vector.load %arg7[%c0_22, %c0_23] : memref<16x1xf32, #tpu.memory_space<vmem>>, vector<16x1xf32>
      %c0_24 = arith.constant 0 : index
      %c0_25 = arith.constant 0 : index
      %31 = vector.load %arg8[%c0_24, %c0_25] : memref<16x1xf32, #tpu.memory_space<vmem>>, vector<16x1xf32>
      %32 = math.log %31 : vector<16x1xf32>
      %33 = arith.addf %30, %32 : vector<16x1xf32>
      %c0_26 = arith.constant 0 : index
      %c0_27 = arith.constant 0 : index
      %34 = vector.load %arg6[%c0_26, %c0_27] : memref<16x1xf32, #tpu.memory_space<vmem>>, vector<16x1xf32>
      tpu.vector_store %arg6[%c0_26, %c0_27], %33 {strides = array<i32>} : memref<16x1xf32, #tpu.memory_space<vmem>>, vector<16x1xf32>,
    } else {
    }
    return
  }
  func.func @transform_0(%arg0: i32, %arg1: i32) -> (i32, i32) {
    %c0_i32 = arith.constant 0 : i32
    %c0_i32_0 = arith.constant 0 : i32
    return %arg0, %c0_i32 : i32, i32
  }
  func.func @transform_1(%arg0: i32, %arg1: i32) -> (i32, i32) {
    %c0_i32 = arith.constant 0 : i32
    %c0_i32_0 = arith.constant 0 : i32
    return %arg1, %c0_i32 : i32, i32
  }
  func.func @transform_2(%arg0: i32, %arg1: i32) -> (i32, i32) {
    %c0_i32 = arith.constant 0 : i32
    %c0_i32_0 = arith.constant 0 : i32
    return %c0_i32, %arg1 : i32, i32
  }
  func.func @transform_3(%arg0: i32, %arg1: i32) -> (i32, i32) {
    %c0_i32 = arith.constant 0 : i32
    return %arg0, %arg1 : i32, i32
  }
  func.func @transform_4(%arg0: i32, %arg1: i32) -> (i32, i32) {
    %c0_i32 = arith.constant 0 : i32
    %c0_i32_0 = arith.constant 0 : i32
    return %arg0, %c0_i32 : i32, i32
  }
}

</mosaic_0001>

<bundles_post_ra>
// kernel: tpu_custom_call.1
= control target key start
LH: loop header
LB: loop body
LE: loop exit
PB: predicated region body
PF: predicated region fallthrough
CT: control target
= control target key end

     0   :  { %vm48_vm0 = vcmask 261120   ;;  %s432_s0 = inlined_call_operand.vmem [shape: f32[16,32], index: 0, kind: input, shape index: {}]   ;;  %s433_s1 = inlined_call_operand.vmem [shape: f32[128,32], index: 1, kind: input, shape index: {}]   ;;  %s434_s2 = inlined_call_operand.vmem [shape: f32[1,128], index: 2, kind: input, shape index: {}]   ;;  %s435_s3 = inlined_call_operand.hbm [shape: f32[16,128], index: 3, kind: output, shape index: {0}]   ;;  %s436_s4 = inlined_call_operand.vmem [shape: f32[16,1], index: 4, kind: output, shape index: {1}]  }
   0x1   :  { %v43_v0 = vld [vmem:[%s433_s1 + $0x78] sm:$0xff]  ;;  %v42_v1 = vld [vmem:[%s433_s1 + $0x70] sm:$0xff] }
   0x2   :  { %210 = vmatpush.xpose.msk.msra.mxu0 %vm48_vm0, %v43_v0  ;;  %228 = vmatpush.xpose.msk.msra.mxu1 %vm48_vm0, %v43_v0 }
   0x3   :  { %10 = vsyncpa [#allocation5], 0  ;;  %v41_v2 = vld [vmem:[%s433_s1 + $0x68] sm:$0xff]  ;;  %v40_v3 = vld [vmem:[%s433_s1 + $0x60] sm:$0xff]  ;;  %vm21_vm1 = vcmask 7168   ;;  %v291_v23 = vmov -inf  }
   0x4   :  { %v39_v4 = vld [vmem:[%s433_s1 + $0x58] sm:$0xff]  ;;  %v38_v5 = vld [vmem:[%s433_s1 + $0x50] sm:$0xff]  ;;  %v37_v6 = vld [vmem:[%s433_s1 + $0x48] sm:$0xff]  ;;  %22 = vst.msk [vmem:[#allocation2] sm:$0xff] %vm21_vm1, %v291_v23  ;;  %v292_v24 = vmov 0   ;;  %v293_v25 = vmov 0.0  }
   0x5   :  { %v36_v7 = vld [vmem:[%s433_s1 + $0x40] sm:$0xff]  ;;  %v35_v8 = vld [vmem:[%s433_s1 + $0x38] sm:$0xff]  ;;  %v34_v9 = vld [vmem:[%s433_s1 + $0x30] sm:$0xff]  ;;  %23 = vst.msk [vmem:[#allocation2 + $0x8] sm:$0xff] %vm21_vm1, %v291_v23  ;;  %250 = vset.pattern.permute.xlu1 %v292_v24  ;;  %251 = vset.pattern.permute.xlu0 %v292_v24  ;;  %s194_s28 = sshll.u32 %s435_s3, 4  ;;  %s295_s29 = smov 128   ;;  %s195_s28 = int_to_ptr.hbm [resolvable:$true] %s194_s28 }
   0x6   :  { %211 = vmatpush.xpose.msk.msra.mxu0 %vm48_vm0, %v42_v1  ;;  %229 = vmatpush.xpose.msk.msra.mxu1 %vm48_vm0, %v42_v1  ;;  %v33_v10 = vld [vmem:[%s433_s1 + $0x28] sm:$0xff]  ;;  %v32_v11 = vld [vmem:[%s433_s1 + $0x20] sm:$0xff]  ;;  %v31_v12 = vld [vmem:[%s433_s1 + $0x18] sm:$0xff]  ;;  %24 = vst.msk [vmem:[#allocation3] sm:$0xff] %vm21_vm1, %v293_v25  ;;  %s296_s30 = smov 8  }
   0x7   :  { %v30_v13 = vld [vmem:[%s433_s1 + $0x10] sm:$0xff]  ;;  %v29_v14 = vld [vmem:[%s433_s1 + $0x8] sm:$0xff]  ;;  %v28_v15 = vld [vmem:[%s433_s1] sm:$0xff]  ;;  %25 = vst.msk [vmem:[#allocation3 + $0x8] sm:$0xff] %vm21_vm1, %v293_v25 }
   0x8   :  { %v26_v16 = vld [vmem:[%s432_s0] sm:$0xff]  ;;  %v27_v17 = vld [vmem:[%s432_s0 + $0x8] sm:$0xff]  ;;  %s294_s0 = smov [#allocation4]  }
   0x9   :  { %v252_v18 = vld [vmem:[%s434_s2] ss:$0 sm:$0xff]  ;;  %s192_s1 = sshll.u32 %s294_s0, 4  ;;  %s193_s1 = int_to_ptr.vmem [resolvable:$true] %s192_s1 }
   0xa   :  { %212 = vmatpush.xpose.msk.msra.mxu0 %vm48_vm0, %v41_v2  ;;  %230 = vmatpush.xpose.msk.msra.mxu1 %vm48_vm0, %v41_v2 }
   0xb   :  { %v130_v26 = vld [vmem:[#allocation2] sm:$0xff] }
   0xc   :  { %v131_v30 = vld [vmem:[#allocation2 + $0x8] sm:$0xff] }
   0xd   :  { %v134_v45 = vld [vmem:[#allocation3] sm:$0xff] }
   0xe   :  { %213 = vmatpush.xpose.msk.msra.mxu0 %vm48_vm0, %v40_v3  ;;  %231 = vmatpush.xpose.msk.msra.mxu1 %vm48_vm0, %v40_v3  ;;  %v135_v50 = vld [vmem:[#allocation3 + $0x8] sm:$0xff] }
  0x12   :  { %214 = vmatpush.xpose.msk.msra.mxu0 %vm48_vm0, %v39_v4  ;;  %232 = vmatpush.xpose.msk.msra.mxu1 %vm48_vm0, %v39_v4 }
  0x16   :  { %215 = vmatpush.xpose.msk.msra.mxu0 %vm48_vm0, %v38_v5  ;;  %233 = vmatpush.xpose.msk.msra.mxu1 %vm48_vm0, %v38_v5 }
  0x1a   :  { %216 = vmatpush.xpose.msk.msra.mxu0 %vm48_vm0, %v37_v6  ;;  %234 = vmatpush.xpose.msk.msra.mxu1 %vm48_vm0, %v37_v6 }
  0x1e   :  { %217 = vmatpush.xpose.msk.msra.mxu0 %vm48_vm0, %v36_v7  ;;  %235 = vmatpush.xpose.msk.msra.mxu1 %vm48_vm0, %v36_v7 }
  0x22   :  { %218 = vmatpush.xpose.msk.msra.mxu0 %vm48_vm0, %v35_v8  ;;  %236 = vmatpush.xpose.msk.msra.mxu1 %vm48_vm0, %v35_v8 }
  0x26   :  { %219 = vmatpush.xpose.msk.msra.mxu0 %vm48_vm0, %v34_v9  ;;  %237 = vmatpush.xpose.msk.msra.mxu1 %vm48_vm0, %v34_v9 }
  0x2a   :  { %220 = vmatpush.xpose.msk.msra.mxu0 %vm48_vm0, %v33_v10  ;;  %238 = vmatpush.xpose.msk.msra.mxu1 %vm48_vm0, %v33_v10 }
  0x2e   :  { %221 = vmatpush.xpose.msk.msra.mxu0 %vm48_vm0, %v32_v11  ;;  %239 = vmatpush.xpose.msk.msra.mxu1 %vm48_vm0, %v32_v11 }
  0x32   :  { %222 = vmatpush.xpose.msk.msra.mxu0 %vm48_vm0, %v31_v12  ;;  %240 = vmatpush.xpose.msk.msra.mxu1 %vm48_vm0, %v31_v12 }
  0x36   :  { %223 = vmatpush.xpose.msk.msra.mxu0 %vm48_vm0, %v30_v13  ;;  %241 = vmatpush.xpose.msk.msra.mxu1 %vm48_vm0, %v30_v13 }
  0x3a   :  { %224 = vmatpush.xpose.msk.msra.mxu0 %vm48_vm0, %v29_v14  ;;  %242 = vmatpush.xpose.msk.msra.mxu1 %vm48_vm0, %v29_v14 }
  0x3e   :  { %225 = vmatpush.xpose.msk.msra.mxu0 %vm48_vm0, %v28_v15  ;;  %243 = vmatpush.xpose.msk.msra.mxu1 %vm48_vm0, %v28_v15 }
  0x41   :  { %226 = vmatmul.msk.f32.vlgmr.msra.gmra.mxu0 %vm48_vm0, %v26_v16  ;;  %227 = vmatmul.msk.f32.vlgmr.msra.gmra.mxu1 %vm48_vm0, %v27_v17 }
  0xbe   :  { %v120_v19 = vpop.f32.mrf.mxu0  ;;  %v123_v20 = vpop.f32.mrf.mxu1 }
  0xbf   :  { %v121_v21 = vadd.f32 %v252_v18, %v120_v19  ;;  %v124_v22 = vadd.f32 %v252_v18, %v123_v20 }
  0xc1   :  { %171 = vst [vmem:[#allocation4] sm:$0xff] %v121_v21  ;;  %126 = vmax.xlane.f32.xlu0 %v121_v21 }
  0xc2   :  { %172 = vst [vmem:[#allocation4 + $0x8] sm:$0xff] %v124_v22 }
  0xc3   :  { %200 = dma.vmem_to_hbm [thread:$0]  %s193_s1, 256, %s195_s28, [#allocation5], %s295_s29, %s295_s29, %s296_s30  }
  0xc9   :  { %128 = vmax.xlane.f32.xlu0 %v124_v22 }
 0x134   :  { %v127_v27 = vpop.xlane.xlu0 %126 }
 0x135   :  { %v132_v28 = vmax.f32 %v130_v26, %v127_v27 }
 0x137   :  { %v136_v29 = vsub.f32 %v130_v26, %v132_v28  ;;  %169 = vst.msk [vmem:[#allocation2] sm:$0xff] %vm21_vm1, %v132_v28  ;;  %146 = vperm.xlu1 %250, %v132_v28  }
 0x139   :  { %v138_v42 = vmul.f32 1.442695, %v136_v29 }
 0x13c   :  { %v129_v31 = vpop.xlane.xlu0 %128 }
 0x13d   :  { %v133_v32 = vmax.f32 %v131_v30, %v129_v31 }
 0x13e   :  { %v176_v58 = vld [vmem:[#allocation2] sm:$0xff] }
 0x13f   :  { %v137_v33 = vsub.f32 %v131_v30, %v133_v32  ;;  %170 = vst.msk [vmem:[#allocation2 + $0x8] sm:$0xff] %vm21_vm1, %v133_v32  ;;  %151 = vperm.xlu1 %250, %v133_v32  }
 0x141   :  { %v140_v43 = vmul.f32 1.442695, %v137_v33 }
 0x146   :  { %v177_v62 = vld [vmem:[#allocation2 + $0x8] sm:$0xff] }
 0x1a9   :  { %v147_v34 = vpop.permute.xlu1 %146 }
 0x1aa   :  { %v154_v35 = vsub.f32 %v121_v21, %v147_v34 }
 0x1ac   :  { %v156_v36 = vmul.f32 1.442695, %v154_v35 }
 0x1ae   :  { %253 = vpow2.f32 %v156_v36 }
 0x1b1   :  { %v152_v37 = vpop.permute.xlu1 %151 }
 0x1b2   :  { %v155_v38 = vsub.f32 %v124_v22, %v152_v37 }
 0x1b4   :  { %v254_v39 = vpop.eup %253  ;;  %v158_v40 = vmul.f32 1.442695, %v155_v38 }
 0x1b5   :  { %160 = vadd.xlane.f32.xlu2 %v254_v39 }
 0x1b6   :  { %255 = vpow2.f32 %v158_v40 }
 0x1b7   :  { %257 = vpow2.f32 %v138_v42 }
 0x1b8   :  { %259 = vpow2.f32 %v140_v43 }
 0x1bc   :  { %v256_v41 = vpop.eup %255 }
 0x1bd   :  { %162 = vadd.xlane.f32.xlu2 %v256_v41  ;;  %v258_v44 = vpop.eup %257 }
 0x1be   :  { %v142_v46 = vmul.f32 %v258_v44, %v134_v45  ;;  %v260_v49 = vpop.eup %259 }
 0x1bf   :  { %v143_v51 = vmul.f32 %v260_v49, %v135_v50 }
 0x228   :  { %v161_v47 = vpop.xlane.xlu2 %160 }
 0x229   :  { %v164_v48 = vadd.f32 %v161_v47, %v142_v46 }
 0x22b   :  { %167 = vst.msk [vmem:[#allocation3] sm:$0xff] %vm21_vm1, %v164_v48 }
 0x230   :  { %v163_v52 = vpop.xlane.xlu2 %162 }
 0x231   :  { %v165_v53 = vadd.f32 %v163_v52, %v143_v51 }
 0x232   :  { %v178_v54 = vld [vmem:[#allocation3] sm:$0xff] }
 0x233   :  { %261 = vlog2.f32 %v178_v54  ;;  %168 = vst.msk [vmem:[#allocation3 + $0x8] sm:$0xff] %vm21_vm1, %v165_v53 }
 0x239   :  { %v262_v55 = vpop.eup %261 }
 0x23a   :  { %v181_v56 = vmul.f32 0.6931472, %v262_v55  ;;  %v179_v57 = vld [vmem:[#allocation3 + $0x8] sm:$0xff] }
 0x23b   :  { %263 = vlog2.f32 %v179_v57 }
 0x23c   :  { %v184_v59 = vadd.f32 %v181_v56, %v176_v58 }
 0x23e   :  { %186 = vst.msk [vmem:[%s436_s4] sm:$0xff] %vm21_vm1, %v184_v59 }
 0x241   :  { %v264_v60 = vpop.eup %263 }
 0x242   :  { %v183_v61 = vmul.f32 0.6931472, %v264_v60 }
 0x244   :  { %v185_v63 = vadd.f32 %v183_v61, %v177_v62 }
 0x246   :  { %187 = vst.msk [vmem:[%s436_s4 + $0x8] sm:$0xff] %vm21_vm1, %v185_v63 }
 0x247   :  { %289 = dma.done.wait [#allocation5], 256  }
 0x248   :  { %290 = vsyncadd [#allocation5], 4294967040 }
 0x249   :  { %209 = vsyncpa [#allocation5], 1 }

</bundles_post_ra>
